<compile_context>
chip_gen: v7x
topology: tpu7x:2x2x1
jax: 0.10.0
libtpu: 0.0.40
codegen_flags: <defaults>
</compile_context>

<pallas_src>
import functools

import jax
import jax.numpy as jnp
from jax.experimental import pallas as pl
from jax.experimental.pallas import tpu as pltpu

# ----------------------------------------------------------------------------
# tiling configuration
# ----------------------------------------------------------------------------

TM_CANDIDATES = (512, 256, 128)     # M tiles for large-M matmuls
TILED_TK = 512                      # K tile when the weight does not fit VMEM
TILED_TN = 256                      # N tile when the weight does not fit VMEM
RESIDENT_W_BYTES = 2 * 1024 * 1024  # bf16 weight size kept fully VMEM-resident
VMEM_LIMIT = 32 * 1024 * 1024       # explicit scoped-VMEM limit (safe on v5e/v6e/v7x)
TAP_CONV_VMEM_BUDGET = 24 * 1024 * 1024


def _round_up(v, m):
    return ((v + m - 1) // m) * m


def _pad_rows(a, rows):
    if a.shape[0] == rows:
        return a
    return jnp.pad(a, ((0, rows - a.shape[0]),) + ((0, 0),) * (a.ndim - 1))


def _pick_tm(M):
    if M <= 512:
        return max(8, _round_up(M, 8))
    for c in TM_CANDIDATES:
        if M % c == 0:
            return c
    return 256          # rare: forces a small row pad


def _pick_tr(R):
    Rp = _round_up(R, 8)
    for c in (2048, 1024, 512, 256, 128, 64, 32, 16, 8):
        if Rp % c == 0:
            return Rp, c
    return Rp, 8


def _apply_act(y, act):
    if act == "none":
        return y
    if act == "relu":
        return jnp.maximum(y, 0.0)
    if act == "sigmoid":
        return jax.nn.sigmoid(y)
    if act == "softplus":
        return jax.nn.softplus(y)
    if act == "gelu":
        return jax.nn.gelu(y, approximate=False)   # PyTorch nn.GELU default (erf)
    raise ValueError(act)


# ----------------------------------------------------------------------------
# Pallas kernel 1: matmul with fused bias + activation (bf16 MXU, f32 accum)
# ----------------------------------------------------------------------------

def _mm_resident_kernel(x_ref, w_ref, b_ref, o_ref, *, act):
    # whole weight resident in VMEM, single dot, no K loop
    y = jnp.dot(x_ref[...], w_ref[...], preferred_element_type=jnp.float32)
    o_ref[...] = _apply_act(y + b_ref[...], act).astype(o_ref.dtype)


def _mm_tiled_kernel(x_ref, w_ref, b_ref, o_ref, acc_ref, *, act):
    @pl.when(pl.program_id(2) == 0)
    def _():
        acc_ref[...] = jnp.zeros_like(acc_ref)

    acc_ref[...] += jnp.dot(x_ref[...], w_ref[...],
                            preferred_element_type=jnp.float32)

    @pl.when(pl.program_id(2) == pl.num_programs(2) - 1)
    def _():
        o_ref[...] = _apply_act(acc_ref[...] + b_ref[...], act).astype(o_ref.dtype)


def pallas_matmul(x, w, bias=None, act="none"):
    """y = act(x @ w + b) with bf16 MXU inputs and f32 accumulation."""
    M, K = x.shape
    K2, N = w.shape
    assert K == K2
    if bias is None:
        bias = jnp.zeros((N,), jnp.float32)

    # lane-dense outputs: pad very narrow N up to 128 (weight-side only, cheap)
    Np = N if N >= 128 else 128
    wb = w.astype(jnp.bfloat16)
    bp = bias.reshape(1, N).astype(jnp.float32)
    if Np != N:
        wb = jnp.pad(wb, ((0, 0), (0, Np - N)))
        bp = jnp.pad(bp, ((0, 0), (0, Np - N)))

    tm = _pick_tm(M)
    Mp = _round_up(M, tm)
    xb = _pad_rows(x.astype(jnp.bfloat16), Mp)

    if K * Np * 2 <= RESIDENT_W_BYTES:
        # small weight: keep it resident in VMEM, grid only over M rows
        out = pl.pallas_call(
            functools.partial(_mm_resident_kernel, act=act),
            out_shape=jax.ShapeDtypeStruct((Mp, Np), jnp.float32),
            grid=(Mp // tm,),
            in_specs=[
                pl.BlockSpec((tm, K), lambda i: (i, 0)),
                pl.BlockSpec((K, Np), lambda i: (0, 0)),
                pl.BlockSpec((1, Np), lambda i: (0, 0)),
            ],
            out_specs=pl.BlockSpec((tm, Np), lambda i: (i, 0)),
            compiler_params=pltpu.CompilerParams(
                dimension_semantics=("parallel",),
                vmem_limit_bytes=VMEM_LIMIT),
        )(xb, wb, bp)
        return out[:M, :N]

    # large weight: tile (M, N, K) with a resident f32 accumulator
    Kp = _round_up(K, TILED_TK)
    Nt = _round_up(Np, TILED_TN)
    xb = jnp.pad(xb, ((0, 0), (0, Kp - K)))
    wb = jnp.pad(wb, ((0, Kp - K), (0, Nt - Np)))
    bp = jnp.pad(bp, ((0, 0), (0, Nt - Np)))
    grid = (Mp // tm, Nt // TILED_TN, Kp // TILED_TK)
    out = pl.pallas_call(
        functools.partial(_mm_tiled_kernel, act=act),
        out_shape=jax.ShapeDtypeStruct((Mp, Nt), jnp.float32),
        grid_spec=pltpu.PrefetchScalarGridSpec(
            num_scalar_prefetch=0,
            grid=grid,
            in_specs=[
                pl.BlockSpec((tm, TILED_TK), lambda i, j, k: (i, k)),
                pl.BlockSpec((TILED_TK, TILED_TN), lambda i, j, k: (k, j)),
                pl.BlockSpec((1, TILED_TN), lambda i, j, k: (0, j)),
            ],
            out_specs=pl.BlockSpec((tm, TILED_TN), lambda i, j, k: (i, j)),
            scratch_shapes=[pltpu.VMEM((tm, TILED_TN), jnp.float32)],
        ),
        compiler_params=pltpu.CompilerParams(
            dimension_semantics=("parallel", "parallel", "arbitrary"),
            vmem_limit_bytes=VMEM_LIMIT),
    )(xb, wb, bp)
    return out[:M, :N]


# ----------------------------------------------------------------------------
# Pallas kernel 2: tap-accumulating 3x3 convolution (no im2col materialization)
# ----------------------------------------------------------------------------

def _conv3x3_tap_kernel(x_ref, w_ref, b_ref, o_ref, *, H, W, C, act):
    # x_ref: (1, H+2, W+2, C)  bf16 spatially padded image
    # w_ref: (9*C, Cout)       bf16, taps stacked along rows (kh*3+kw major)
    # o_ref: (1, H*W, Cout)    f32
    cout = o_ref.shape[-1]
    acc = jnp.zeros((H * W, cout), jnp.float32)
    for kh in range(3):
        for kw in range(3):
            sub = x_ref[0, kh:kh + H, kw:kw + W, :]          # (H, W, C)
            sub = sub.reshape(H * W, C)
            t = kh * 3 + kw
            wk = w_ref[t * C:(t + 1) * C, :]                 # (C, Cout)
            acc = acc + jnp.dot(sub, wk, preferred_element_type=jnp.float32)
    o_ref[0] = _apply_act(acc + b_ref[...], act).astype(o_ref.dtype)


def _conv3x3_taps(x, w, b, act):
    B, H, W, C = x.shape
    Cout = w.shape[1]
    Cp = Cout if Cout >= 128 else 128       # lane-dense output block
    wb = w.astype(jnp.bfloat16)
    bp = b.reshape(1, Cout).astype(jnp.float32)
    if Cp != Cout:
        wb = jnp.pad(wb, ((0, 0), (0, Cp - Cout)))
        bp = jnp.pad(bp, ((0, 0), (0, Cp - Cout)))
    xp = jnp.pad(x, ((0, 0), (1, 1), (1, 1), (0, 0))).astype(jnp.bfloat16)
    out = pl.pallas_call(
        functools.partial(_conv3x3_tap_kernel, H=H, W=W, C=C, act=act),
        out_shape=jax.ShapeDtypeStruct((B, H * W, Cp), jnp.float32),
        grid=(B,),
        in_specs=[
            pl.BlockSpec((1, H + 2, W + 2, C), lambda b_: (b_, 0, 0, 0)),
            pl.BlockSpec((9 * C, Cp), lambda b_: (0, 0)),
            pl.BlockSpec((1, Cp), lambda b_: (0, 0)),
        ],
        out_specs=pl.BlockSpec((1, H * W, Cp), lambda b_: (b_, 0, 0)),
        compiler_params=pltpu.CompilerParams(
            dimension_semantics=("parallel",),
            vmem_limit_bytes=VMEM_LIMIT),
    )(xp, wb, bp)
    return out[:, :, :Cout].reshape(B, H, W, Cout)


def _conv3x3_im2col(x, w, b, act):
    B, H, W, C = x.shape
    xp = jnp.pad(x, ((0, 0), (1, 1), (1, 1), (0, 0)))
    cols = [xp[:, kh:kh + H, kw:kw + W, :] for kh in range(3) for kw in range(3)]
    patches = jnp.concatenate(cols, axis=-1).reshape(B * H * W, 9 * C)
    y = pallas_matmul(patches, w, b, act)
    return y.reshape(B, H, W, -1)


def conv3x3(x, w, b, act="none"):
    """3x3 'same' convolution; w: (9*Cin, Cout)."""
    B, H, W, C = x.shape
    Cout = w.shape[1]
    Cp = max(Cout, 128)
    # VMEM estimate for the per-image tap kernel (bf16 in, f32 out, temps)
    est = (2 * (H + 2) * (W + 2) * C * 2
           + 2 * H * W * Cp * 4
           + 3 * H * W * max(C, Cp) * 4
           + 2 * 9 * C * Cp * 2)
    if W % 16 == 0 and est < TAP_CONV_VMEM_BUDGET:
        return _conv3x3_taps(x, w, b, act)
    # TODO(synk): very large images should use a row-tiled tap kernel with
    # manual halo DMA instead of this im2col fallback.
    return _conv3x3_im2col(x, w, b, act)


# ----------------------------------------------------------------------------
# conv / deconv wrappers (BN folded in, ReLU fused into the matmul epilogue)
# ----------------------------------------------------------------------------

def conv1x1(x, p, act="none"):
    B, H, W, C = x.shape
    y = pallas_matmul(x.reshape(B * H * W, C), p["w"], p["b"], act)
    return y.reshape(B, H, W, -1)


def _bn_scale_shift(bn, eps=1e-5):
    # TODO(synk): BatchNorm folded in eval mode (running statistics); train-mode
    # batch statistics are not modeled.
    scale = bn["gamma"] / jnp.sqrt(bn["var"] + eps)
    shift = bn["beta"] - bn["mean"] * scale
    return scale, shift


def deconv2x2_s2_bn_relu(x, w, bn):
    """ConvTranspose2d(k=2,s=2,bias=False) + BatchNorm(eval) + ReLU, as a single
    fused Pallas matmul (Cin -> 4*Cout) followed by spatial interleave."""
    B, H, W, C = x.shape
    Cout = w.shape[-1]
    scale, shift = _bn_scale_shift(bn)
    wf = (w * scale[None, None, None, :]).transpose(2, 0, 1, 3).reshape(C, 4 * Cout)
    bf = jnp.tile(shift, 4)
    y = pallas_matmul(x.reshape(B * H * W, C), wf, bf, act="relu")
    y = y.reshape(B, H, W, 2, 2, Cout).transpose(0, 1, 3, 2, 4, 5)
    return y.reshape(B, 2 * H, 2 * W, Cout)


def conv3x3_bn_relu(x, p, bn):
    scale, shift = _bn_scale_shift(bn)
    wf = p["w"] * scale[None, :]
    bf = p["b"] * scale + shift
    return conv3x3(x, wf, bf, act="relu")


# ----------------------------------------------------------------------------
# Pallas kernel 3: AttractorLayerUnnormed inverse-attractor bin update
#   b_new = b + mean_a [ dx / (1 + alpha * dx^2) ],  dx = A_a - b   (gamma == 2)
# ----------------------------------------------------------------------------

def _attractor_kernel(a_ref, b_ref, o_ref, *, n_att, alpha):
    b = b_ref[...]
    acc = jnp.zeros_like(b)
    for a in range(n_att):
        dx = a_ref[:, a:a + 1] - b
        # dx*dx avoids the pow lowering; approx reciprocal runs on the EUP slot
        acc = acc + dx * pl.reciprocal(1.0 + alpha * dx * dx, approx=True)
    o_ref[...] = b + acc * (1.0 / n_att)


def attractor_update(A2d, b2d, alpha=1000.0):
    R, nA = A2d.shape
    nB = b2d.shape[1]
    Rp, tr = _pick_tr(R)
    Ap = _pad_rows(A2d.astype(jnp.float32), Rp)
    Bp = _pad_rows(b2d.astype(jnp.float32), Rp)
    out = pl.pallas_call(
        functools.partial(_attractor_kernel, n_att=nA, alpha=alpha),
        out_shape=jax.ShapeDtypeStruct((Rp, nB), jnp.float32),
        grid=(Rp // tr,),
        in_specs=[
            pl.BlockSpec((tr, nA), lambda i: (i, 0)),
            pl.BlockSpec((tr, nB), lambda i: (i, 0)),
        ],
        out_specs=pl.BlockSpec((tr, nB), lambda i: (i, 0)),
        compiler_params=pltpu.CompilerParams(
            dimension_semantics=("parallel",)),
    )(Ap, Bp)
    return out[:R]


# ----------------------------------------------------------------------------
# Pallas kernel 4: fused ConditionalLogBinomial tail
#   pt (R,4) -> p, temperature; log-binomial logits over K bins -> softmax
#   -> depth = sum(prob * bin_center)
# ----------------------------------------------------------------------------

def _clb_depth_kernel(pt_ref, c_ref, k_ref, coef_ref, o_ref, *,
                      K, min_temp, max_temp):
    p_eps = 1e-4
    pt = pt_ref[...]
    p0 = pt[:, 0:1] + p_eps
    p1 = pt[:, 1:2] + p_eps
    p = p0 / (p0 + p1)
    t0 = pt[:, 2:3] + p_eps
    t1 = pt[:, 3:4] + p_eps
    t = t0 / (t0 + t1)
    t = (max_temp - min_temp) * t + min_temp

    eps = 1e-4
    x = jnp.clip(p, eps, 1.0)
    omx = jnp.clip(1.0 - p, eps, 1.0)
    k = k_ref[...]          # (1, K)
    coef = coef_ref[...]    # (1, K) precomputed log-binomial coefficient
    y = coef + k * jnp.log(x) + (K - 1.0 - k) * jnp.log(omx)
    y = y / jnp.maximum(t, 1e-7)
    y = y - jnp.max(y, axis=-1, keepdims=True)
    e = jnp.exp(y)
    probs = e * pl.reciprocal(jnp.sum(e, axis=-1, keepdims=True), approx=True)
    o_ref[...] = jnp.sum(probs * c_ref[...], axis=-1, keepdims=True)


def clb_depth(pt2d, centers2d, K=64, min_temp=0.0212, max_temp=50.0):
    R = pt2d.shape[0]
    eps = 1e-7
    n = jnp.float32(K - 1) + eps
    kk = jnp.arange(K, dtype=jnp.float32) + eps
    coef = n * jnp.log(n) - kk * jnp.log(kk) - (n - kk) * jnp.log(n - kk + eps)
    k_idx = jnp.arange(K, dtype=jnp.float32).reshape(1, K)
    coef = coef.reshape(1, K)

    Rp, tr = _pick_tr(R)
    ptp = _pad_rows(pt2d.astype(jnp.float32), Rp)
    cp = _pad_rows(centers2d.astype(jnp.float32), Rp)
    out = pl.pallas_call(
        functools.partial(_clb_depth_kernel, K=K,
                          min_temp=min_temp, max_temp=max_temp),
        out_shape=jax.ShapeDtypeStruct((Rp, 1), jnp.float32),
        grid=(Rp // tr,),
        in_specs=[
            pl.BlockSpec((tr, 4), lambda i: (i, 0)),
            pl.BlockSpec((tr, K), lambda i: (i, 0)),
            pl.BlockSpec((1, K), lambda i: (0, 0)),
            pl.BlockSpec((1, K), lambda i: (0, 0)),
        ],
        out_specs=pl.BlockSpec((tr, 1), lambda i: (i, 0)),
        compiler_params=pltpu.CompilerParams(
            dimension_semantics=("parallel",)),
    )(ptp, cp, k_idx, coef)
    return out[:R]


# ----------------------------------------------------------------------------
# bilinear resize (plain JAX glue, matches torch interpolate semantics closely)
# ----------------------------------------------------------------------------

def bilinear_resize(x, oh, ow, align_corners):
    B, H, W, C = x.shape

    def grid(o, n):
        i = jnp.arange(o, dtype=jnp.float32)
        if align_corners:
            src = i * ((n - 1) / (o - 1)) if o > 1 else jnp.zeros_like(i)
        else:
            src = (i + 0.5) * (n / o) - 0.5
        src = jnp.clip(src, 0.0, n - 1)
        lo = jnp.floor(src).astype(jnp.int32)
        hi = jnp.minimum(lo + 1, n - 1)
        frac = src - lo.astype(jnp.float32)
        return lo, hi, frac

    ylo, yhi, fy = grid(oh, H)
    xlo, xhi, fx = grid(ow, W)
    top = x[:, ylo]
    bot = x[:, yhi]

    def horiz(r):
        return (r[:, :, xlo] * (1.0 - fx)[None, None, :, None]
                + r[:, :, xhi] * fx[None, None, :, None])

    return (horiz(top) * (1.0 - fy)[None, :, None, None]
            + horiz(bot) * fy[None, :, None, None])


# ----------------------------------------------------------------------------
# deterministic parameter construction (synthetic weights, no checkpoints)
# ----------------------------------------------------------------------------

EMBED_DIM = 192
CHANNELS_IN = EMBED_DIM * 8          # 1536
CHANNELS_OUT = EMBED_DIM             # 192
NUM_FILTERS = [32, 32, 32]
NUM_OUT_FEATURES = [32, 32, 32, 192]
N_BINS = 64
BIN_EMB = 128
BTLNCK = 256
N_ATTRACTORS = [16, 8, 4, 1]
MAX_DEPTH = 10.0
MIN_DEPTH = 1e-3
MIN_TEMP = 0.0212
MAX_TEMP = 50.0


def init_params(key):
    keys = iter(jax.random.split(key, 64))

    def nrm(shape, std):
        return jax.random.normal(next(keys), shape, jnp.float32) * std

    def conv3(cin, cout, std):
        return dict(w=nrm((9 * cin, cout), std), b=jnp.zeros((cout,), jnp.float32))

    def conv1(cin, cout, std=None):
        std = (1.0 / cin) ** 0.5 if std is None else std
        return dict(w=nrm((cin, cout), std), b=jnp.zeros((cout,), jnp.float32))

    def bn(c):
        return dict(gamma=jnp.ones((c,), jnp.float32), beta=jnp.zeros((c,), jnp.float32),
                    mean=jnp.zeros((c,), jnp.float32), var=jnp.ones((c,), jnp.float32))

    P = {}
    # encoder stand-in (stride-32 patch embedding -> 1536 channels)
    P["enc_w"] = nrm((3 * 32 * 32, CHANNELS_IN), 0.02)
    P["enc_b"] = jnp.zeros((CHANNELS_IN,), jnp.float32)

    # Decoder (deconv kernel 2 -> padding 0, output_padding 0; bias=False)
    in_c = CHANNELS_IN
    P["deconv"], P["deconv_bn"] = [], []
    for f in NUM_FILTERS:
        P["deconv"].append(nrm((2, 2, in_c, f), 0.001))
        P["deconv_bn"].append(bn(f))
        in_c = f
    P["conv_layers"] = conv3(NUM_FILTERS[-1], CHANNELS_OUT, 0.001)
    P["conv_layers_bn"] = bn(CHANNELS_OUT)
    P["last1"] = conv3(CHANNELS_OUT, CHANNELS_OUT, 0.001)
    P["last2"] = conv3(CHANNELS_OUT, 1, 0.001)

    # metric-bins head
    P["bottle1"] = conv3(CHANNELS_IN, BTLNCK, 0.001)
    P["bottle2"] = conv3(BTLNCK, BTLNCK, 0.001)
    P["seed_reg1"] = conv1(BTLNCK, 256)
    P["seed_reg2"] = conv1(256, N_BINS)
    P["seed_proj1"] = conv1(BTLNCK, BIN_EMB)
    P["seed_proj2"] = conv1(BIN_EMB, BIN_EMB)
    P["proj1"] = [conv1(c, BIN_EMB) for c in NUM_OUT_FEATURES]
    P["proj2"] = [conv1(BIN_EMB, BIN_EMB) for _ in NUM_OUT_FEATURES]
    P["att1"] = [conv1(BIN_EMB, 128) for _ in N_ATTRACTORS]
    P["att2"] = [conv1(128, a) for a in N_ATTRACTORS]
    P["clb1"] = conv1(CHANNELS_OUT + 1 + BIN_EMB, (CHANNELS_OUT + 1 + BIN_EMB) // 2)
    P["clb2"] = conv1((CHANNELS_OUT + 1 + BIN_EMB) // 2, 4)
    return P


# ----------------------------------------------------------------------------
# EVPDepth forward
# ----------------------------------------------------------------------------

def evpdepth_forward(params, x_nchw):
    B, C, H, W = x_nchw.shape
    x = jnp.transpose(x_nchw, (0, 2, 3, 1)).astype(jnp.float32)  # NCHW -> NHWC
    x = x * 2.0 - 1.0

    # TODO(synk): the real EVPDepthEncoder wraps a Stable-Diffusion VAE encoder,
    # a cross-attention UNet, CLIP text embeddings and the aggregation module,
    # all loaded from external checkpoints; a deterministic stride-32 patch
    # embedding (Pallas matmul + ReLU) stands in and produces conv_feats with
    # the same (B, 1536, H/32, W/32) contract.
    ph, pw = H // 32, W // 32
    patches = x.reshape(B, ph, 32, pw, 32, C).transpose(0, 1, 3, 2, 4, 5)
    patches = patches.reshape(B * ph * pw, 32 * 32 * C)
    conv_feats = pallas_matmul(patches, params["enc_w"], params["enc_b"],
                               "relu").reshape(B, ph, pw, CHANNELS_IN)

    # ---------------- Decoder ----------------
    feat = conv_feats
    x_blocks = []                                    # intermediate (ReLU hook) outputs
    for i in range(len(NUM_FILTERS)):
        feat = deconv2x2_s2_bn_relu(feat, params["deconv"][i], params["deconv_bn"][i])
        x_blocks.append(feat)
    feat = conv3x3_bn_relu(feat, params["conv_layers"], params["conv_layers_bn"])
    _, h1, w1, _ = feat.shape
    feat = bilinear_resize(feat, 2 * h1, 2 * w1, align_corners=False)
    x_blocks.append(feat)                            # appended after first upsample
    out = bilinear_resize(feat, 4 * h1, 4 * w1, align_corners=False)
    d = conv3x3(out, params["last1"]["w"], params["last1"]["b"], "relu")
    out_depth_raw = conv3x3(d, params["last2"]["w"], params["last2"]["b"], "none")

    # ---------------- metric-bins head ----------------
    xb = conv3x3(conv_feats, params["bottle1"]["w"], params["bottle1"]["b"], "relu")
    xb = conv3x3(xb, params["bottle2"]["w"], params["bottle2"]["b"], "none")

    s = conv1x1(xb, params["seed_reg1"], "relu")
    seed_b_centers = conv1x1(s, params["seed_reg2"], "softplus")
    b_prev = seed_b_centers                          # bin_centers_type == 'softplus'
    pe = conv1x1(xb, params["seed_proj1"], "relu")
    prev_b_embedding = conv1x1(pe, params["seed_proj2"], "none")

    b_embedding = None
    for i, blk in enumerate(x_blocks):
        e = conv1x1(blk, params["proj1"][i], "relu")
        b_embedding = conv1x1(e, params["proj2"][i], "none")
        _, h, w, _ = b_embedding.shape
        pbe = bilinear_resize(prev_b_embedding, h, w, align_corners=True)
        a_in = b_embedding + pbe
        A = conv1x1(a_in, params["att1"][i], "relu")
        A = conv1x1(A, params["att2"][i], "softplus")      # (B, h, w, n_attractors)
        bp = bilinear_resize(b_prev, h, w, align_corners=True)
        b_new = attractor_update(A.reshape(-1, N_ATTRACTORS[i]),
                                 bp.reshape(-1, N_BINS),
                                 alpha=1000.0).reshape(B, h, w, N_BINS)
        b_prev = b_new
        prev_b_embedding = b_embedding
    b_centers = b_prev

    rel_cond = jax.nn.sigmoid(out_depth_raw) * MAX_DEPTH
    _, Ho, Wo, _ = out.shape
    rel_cond = bilinear_resize(rel_cond, Ho, Wo, align_corners=True)
    last = jnp.concatenate([out, rel_cond], axis=-1)               # 193 ch
    b_emb_r = bilinear_resize(b_embedding, Ho, Wo, align_corners=True)

    # ConditionalLogBinomial: 1x1 conv mlp (GELU, Softplus) -> fused Pallas tail
    pt_in = jnp.concatenate([last, b_emb_r], axis=-1)              # 321 ch
    pt = conv1x1(pt_in, params["clb1"], "gelu")
    pt = conv1x1(pt, params["clb2"], "softplus")                   # (B, Ho, Wo, 4)
    bc_r = bilinear_resize(b_centers, Ho, Wo, align_corners=True)
    depth = clb_depth(pt.reshape(-1, 4), bc_r.reshape(-1, N_BINS),
                      K=N_BINS, min_temp=MIN_TEMP, max_temp=MAX_TEMP)
    pred = depth.reshape(B, Ho, Wo, 1).transpose(0, 3, 1, 2)       # back to NCHW
    return {"pred_d": pred}


# ----------------------------------------------------------------------------

if __name__ == "__main__":
    key = jax.random.PRNGKey(0)
    pkey, xkey = jax.random.split(key)
    params = init_params(pkey)

    # small image-like input (NCHW); conv_feats = input / 32 spatially
    x = jax.random.uniform(xkey, (1, 3, 64, 64), jnp.float32)

    out = evpdepth_forward(params, x)
    pred = jax.block_until_ready(out["pred_d"])

    assert pred.shape == (1, 1, 64, 64), pred.shape
    assert bool(jnp.all(jnp.isfinite(pred))), "non-finite depth values"
    print("KERNEL_OK")
</pallas_src>

<mosaic_0001>
module attributes {stable_mosaic.version = 11 : i64} {
  func.func @_mm_tiled_kernel(%arg0: i32, %arg1: i32, %arg2: i32, %arg3: memref<8x512xbf16, #tpu.memory_space<vmem>>, %arg4: memref<512x256xbf16, #tpu.memory_space<vmem>>, %arg5: memref<1x256xf32, #tpu.memory_space<vmem>>, %arg6: memref<8x256xf32, #tpu.memory_space<vmem>>, %arg7: memref<8x256xf32, #tpu.memory_space<vmem>>) attributes {dimension_semantics = [#tpu.dimension_semantics<parallel>, #tpu.dimension_semantics<parallel>, #tpu.dimension_semantics<arbitrary>], iteration_bounds = array<i64: 1, 6, 6>, scalar_prefetch = 0 : i64, scratch_operands = 1 : i64, tpu.core_type = #tpu.core_type<tc>, window_params = [{transform_indices = @transform_0, window_bounds = array<i64: 8, 512>}, {transform_indices = @transform_1, window_bounds = array<i64: 512, 256>}, {transform_indices = @transform_2, window_bounds = array<i64: 1, 256>}, {transform_indices = @transform_3, window_bounds = array<i64: 8, 256>}]} {
    %c0_i32 = arith.constant 0 : i32
    %0 = arith.cmpi eq, %arg2, %c0_i32 : i32
    %1 = arith.extui %0 : i1 to i32
    %c0_i32_0 = arith.constant 0 : i32
    %2 = arith.cmpi ne, %1, %c0_i32_0 : i32
    scf.if %2 {
      %cst_9 = arith.constant 0.000000e+00 : f32
      %12 = vector.broadcast %cst_9 : f32 to vector<8x256xf32>
      %c0_10 = arith.constant 0 : index
      %c0_11 = arith.constant 0 : index
      %13 = vector.load %arg7[%c0_10, %c0_11] : memref<8x256xf32, #tpu.memory_space<vmem>>, vector<8x256xf32>
      tpu.vector_store %arg7[%c0_10, %c0_11], %12 {strides = array<i32>} : memref<8x256xf32, #tpu.memory_space<vmem>>, vector<8x256xf32>,
    } else {
    }
    %c0 = arith.constant 0 : index
    %c0_1 = arith.constant 0 : index
    %3 = vector.load %arg7[%c0, %c0_1] : memref<8x256xf32, #tpu.memory_space<vmem>>, vector<8x256xf32>
    %c0_2 = arith.constant 0 : index
    %c0_3 = arith.constant 0 : index
    %4 = vector.load %arg3[%c0_2, %c0_3] : memref<8x512xbf16, #tpu.memory_space<vmem>>, vector<8x512xbf16>
    %c0_4 = arith.constant 0 : index
    %c0_5 = arith.constant 0 : index
    %5 = vector.load %arg4[%c0_4, %c0_5] : memref<512x256xbf16, #tpu.memory_space<vmem>>, vector<512x256xbf16>
    %cst = arith.constant dense<0.000000e+00> : vector<8x256xf32>
    %6 = tpu.matmul %4, %5, %cst {dimension_numbers = #tpu.dot_dimension_numbers<[1], [0], [0], [1], [0, 0, 1, 1], [], []>} : vector<8x512xbf16>, vector<512x256xbf16>, vector<8x256xf32> -> vector<8x256xf32>
    %7 = arith.addf %3, %6 : vector<8x256xf32>
    %c0_6 = arith.constant 0 : index
    %c0_7 = arith.constant 0 : index
    %8 = vector.load %arg7[%c0_6, %c0_7] : memref<8x256xf32, #tpu.memory_space<vmem>>, vector<8x256xf32>
    tpu.vector_store %arg7[%c0_6, %c0_7], %7 {strides = array<i32>} : memref<8x256xf32, #tpu.memory_space<vmem>>, vector<8x256xf32>,
    %c5_i32 = arith.constant 5 : i32
    %9 = arith.cmpi eq, %arg2, %c5_i32 : i32
    %10 = arith.extui %9 : i1 to i32
    %c0_i32_8 = arith.constant 0 : i32
    %11 = arith.cmpi ne, %10, %c0_i32_8 : i32
    scf.if %11 {
      %c0_9 = arith.constant 0 : index
      %c0_10 = arith.constant 0 : index
      %12 = vector.load %arg7[%c0_9, %c0_10] : memref<8x256xf32, #tpu.memory_space<vmem>>, vector<8x256xf32>
      %c0_11 = arith.constant 0 : index
      %c0_12 = arith.constant 0 : index
      %13 = vector.load %arg5[%c0_11, %c0_12] : memref<1x256xf32, #tpu.memory_space<vmem>>, vector<1x256xf32>
      %14 = vector.broadcast %13 : vector<1x256xf32> to vector<8x256xf32>
      %15 = arith.addf %12, %14 : vector<8x256xf32>
      %cst_13 = arith.constant 0.000000e+00 : f32
      %16 = vector.broadcast %cst_13 : f32 to vector<8x256xf32>
      %17 = arith.maximumf %15, %16 : vector<8x256xf32>
      %c0_14 = arith.constant 0 : index
      %c0_15 = arith.constant 0 : index
      %18 = vector.load %arg6[%c0_14, %c0_15] : memref<8x256xf32, #tpu.memory_space<vmem>>, vector<8x256xf32>
      tpu.vector_store %arg6[%c0_14, %c0_15], %17 {strides = array<i32>} : memref<8x256xf32, #tpu.memory_space<vmem>>, vector<8x256xf32>,
    } else {
    }
    return
  }
  func.func @transform_0(%arg0: i32, %arg1: i32, %arg2: i32) -> (i32, i32) {
    %c0_i32 = arith.constant 0 : i32
    return %arg0, %arg2 : i32, i32
  }
  func.func @transform_1(%arg0: i32, %arg1: i32, %arg2: i32) -> (i32, i32) {
    %c0_i32 = arith.constant 0 : i32
    return %arg2, %arg1 : i32, i32
  }
  func.func @transform_2(%arg0: i32, %arg1: i32, %arg2: i32) -> (i32, i32) {
    %c0_i32 = arith.constant 0 : i32
    %c0_i32_0 = arith.constant 0 : i32
    return %c0_i32, %arg1 : i32, i32
  }
  func.func @transform_3(%arg0: i32, %arg1: i32, %arg2: i32) -> (i32, i32) {
    %c0_i32 = arith.constant 0 : i32
    return %arg0, %arg1 : i32, i32
  }
}

</mosaic_0001>

<bundles_post_ra>
// kernel: tpu_custom_call.1
= control target key start
LH: loop header
LB: loop body
LE: loop exit
PB: predicated region body
PF: predicated region fallthrough
CT: control target
= control target key end

     0   :  { %s2058_s0 = inlined_call_operand.hbm [shape: bf16[8,3072], index: 0, kind: input, shape index: {}]   ;;  %s2059_s1 = inlined_call_operand.hbm [shape: bf16[3072,1536], index: 1, kind: input, shape index: {}]   ;;  %s2060_s2 = inlined_call_operand.hbm [shape: f32[1,1536], index: 2, kind: input, shape index: {}]   ;;  %s2061_s3 = inlined_call_operand.hbm [shape: f32[8,1536], index: 3, kind: output, shape index: {}]  }
   0x1   :  { %2074 = sst [smem:[#allocation20_spill]] %s2058_s0 }
   0x2   :  { %2075 = sst [smem:[#allocation21_spill]] %s2059_s1 }
   0x3   :  { %2076 = sst [smem:[#allocation22_spill]] %s2061_s3 }
   0x4   :  { %8 = vsyncpa [#allocation4], 0 }
   0x5   :  { %10 = vsyncpa [#allocation4 + $0x1], 0 }
   0x6   :  { %11 = vsyncpa [#allocation7], 0 }
   0x7   :  { %13 = vsyncpa [#allocation7 + $0x1], 0 }
   0x8   :  { %14 = vsyncpa [#allocation5], 0 }
   0x9   :  { %16 = vsyncpa [#allocation5 + $0x1], 0  ;;  %s1581_s12 = smov 0   ;;  %s1583_s13 = smov 0  }
   0xa   :  { %s1585_s14 = smov 0   ;;  %s1587_s15 = smov 0  }
   0xb   :  { %s1589_s16 = smov 0   ;;  %s1591_s17 = smov 0  }
   0xc   :  { %s1593_s18 = smov 0   ;;  %s1595_s19 = smov 0  }
   0xd   :  { %s1597_s20 = smov 0   ;;  %s1599_s21 = smov 0  }
   0xe   :  { %s1601_s22 = smov 0   ;;  %s1603_s23 = smov 0  }
   0xf   :  { %s1605_s24 = smov 0   ;;  %s1607_s25 = smov 0  }
  0x10 LB: > { %2077 = sst [smem:[#allocation14_spill]] %s1531_s20  ;;  %p2063_p0 = scmp.eq.s32.totalorder %s1551_s25, 0  ;;  %s1551_s25 = sphi %s1607_s25, %s22_s25   ;;  %s1547_s24 = sphi %s1605_s24, %s2118_s24   ;;  %s1543_s23 = sphi %s1603_s23, %s2128_s23   ;;  %s1539_s22 = sphi %s1601_s22, %s2116_s22   ;;  %s1535_s21 = sphi %s1599_s21, %s2127_s21   ;;  %s1531_s20 = sphi %s1597_s20, %s2115_s20   ;;  %s1527_s19 = sphi %s1595_s19, %s2126_s19   ;;  %s1523_s18 = sphi %s1593_s18, %s2125_s18   ;;  %s1519_s17 = sphi %s1591_s17, %s2124_s17   ;;  %s1515_s16 = sphi %s1589_s16, %s2123_s16   ;;  %s1511_s15 = sphi %s1587_s15, %s2122_s15   ;;  %s1507_s14 = sphi %s1585_s14, %s2121_s14   ;;  %s1503_s13 = sphi %s1583_s13, %s2120_s13   ;;  %s1499_s12 = sphi %s1581_s12, %s2119_s12  }
  0x11   : > { %2078 = sst [smem:[#allocation15_spill]] %s1539_s22  ;;  %p85_p1 = scmp.ne.s32.totalorder %s1519_s17, %s1515_s16 }
  0x12   : > { %2079 = sst [smem:[#allocation16_spill]] %s1547_s24  ;;  %p2062_p4 = scmp.lt.s32.totalorder %s1551_s25, 36 }
  0x13   : > { %p87_p3 = por %p85_p1, %p2063_p0  ;;  %s190_s28 = sand.u32 1, %s1551_s25  }
  0x14   : > { %s192_s29 = sand.u32 1, %s1519_s17   ;;  %s977_s4 = sshll.u32 %s1547_s24, 1 }
  0x15   : > { %s975_s30 = sshll.u32 %s192_s29, 9  ;;  %s1066_s5 = smul.u32 768, %s1543_s23 }
  0x16   : > { %s194_s6 = scalar_lea.vmem [#allocation6], %s975_s30  ;;  %p1669_p5 = pnand %p2062_p4, %p87_p3 }
  0x17   : > { %s204_s7 = sshll.u32 %s194_s6, 4  ;;  %s201_s9 = sadd.s32 %s1066_s5, %s977_s4  ;;  %s1665_s7 = int_to_ptr.vmem [resolvable:$true] %s204_s7 }
  0x18   : > { %s979_s10 = sshll.u32 %s201_s9, 6  ;;  %s2081_s1 = sld [smem:[#allocation21_spill]] }
  0x19   : > { %p983_p6 = scmp.ge.s32.totalorder %s1551_s25, 1  ;;  %s1679_s29 = scalar_lea.sflag [#allocation7], %s190_s28 }
  0x1a   : > { %p1309_p8 = pneg %p1669_p5 }
  0x1e   : > { %s1676_s26 = scalar_lea.hbm %s2081_s1, %s979_s10  ;;  %s1312_s27 = scalar_lea.hbm %s2081_s1, 294912 }
  0x1f   : > { %s1307_s30 = scalar_lea.hbm %s1676_s26, 8192  ;;  %p1313_p11 = scmp.lt.u32.totalorder %s1676_s26, %s2081_s1 }
  0x20   : > { %p1308_p7 = scmp.ne.s32.totalorder %s1676_s26, %s1307_s30  ;;  %p1314_p12 = scmp.lt.u32.totalorder %s1312_s27, %s1307_s30 }
  0x21   : > { %p1316_p1 = scmp.lt.u32.totalorder %s1307_s30, %s1676_s26 }
  0x22   : > { %p1310_p9 = pnand %p1309_p8, %p1308_p7  ;;  %p1315_p13 = por %p1314_p12, %p1313_p11 }
  0x24   : > { %p1311_p10 = pneg %p1310_p9  ;;  %p1317_p3 = por %p1316_p1, %p1315_p13 }
  0x26   : > { %p1318_p4 = pnand %p1317_p3, %p1311_p10 }
  0x28   : > { %1321 = shalt.err (!%p1318_p4)
}
  0x29   : > { %s1322_s28 = scalar_lea.vmem %s1665_s7, 8192  ;;  %s1553_s10 = smov [#allocation6]  }
  0x2a   : > { %p1323_p7 = scmp.ne.s32.totalorder %s1665_s7, %s1322_s28  ;;  %s1327_s11 = sshll.u32 %s1553_s10, 4  ;;  %s1328_s11 = int_to_ptr.vmem [resolvable:$false] %s1327_s11 }
  0x2b   : > { %s1329_s4 = scalar_lea.vmem %s1328_s11, 16384  ;;  %p1330_p0 = scmp.lt.s32.totalorder %s1665_s7, %s1328_s11 }
  0x2c   : > { %p1325_p9 = pnand %p1323_p7, %p1309_p8  ;;  %p1331_p11 = scmp.lt.s32.totalorder %s1329_s4, %s1322_s28 }
  0x2e   : > { %p1326_p2 = pneg %p1325_p9  ;;  %p1332_p12 = por %p1331_p11, %p1330_p0 }
  0x30   : > { %p1333_p13 = pnand %p1332_p12, %p1326_p2 }
  0x32   : > { %1336 = shalt.err (!%p1333_p13)
}
  0x33   : > { %s1554_s30 = smov 768   ;;  %s1555_s5 = smov 128  }
  0x34   : > { %s1556_s27 = smov 8   ;;  %p231_p0 = scmp.lt.s32.totalorder %s1551_s25, 37 }
  0x35   : > { %1081 = dma.hbm_to_vmem [thread:$0]  (!%p1669_p5), %s1676_s26, 8192, %s1665_s7, %s1679_s29, %s1554_s30, %s1555_s5, %s1556_s27  }
  0x36   : > { %p1710_p2 = pnand %p983_p6, %p231_p0  ;;  %s1715_s9 = sadd.s32 4294967295, %s1551_s25  }
  0x37   : > { %s34_s28 = sadd.s32 1, %s1543_s23  ;;  %s50_s10 = sadd.s32 1, %s1531_s20 }
  0x38   : > { %s2082_s6 = scalar_select %p1710_p2, 1, 0 }
  0x39   : > { %p35_p4 = scmp.ge.s32.totalorder %s34_s28, 6  ;;  %p57_p5 = scmp.ne.s32.totalorder %s1531_s20, %s1527_s19 }
  0x3a   : > { %p63_p8 = scmp.ne.s32.totalorder %s1527_s19, %s1523_s18  ;;  %s2084_s26 = sadd.s32 1, %s1547_s24 }
  0x3b   : > { %s2130_s28 = smov (%p35_p4, %s34_s28), 0  ;;  %s2132_s26 = smov (!%p35_p4, %s2084_s26), %s1547_s24 }
  0x3c   : > { %2083 = sst [smem:[#allocation17_spill]] %s2130_s28  ;;  %s46_s7 = ssub.s32 %s1543_s23, %s2130_s28 }
  0x3d   : > { %p2085_p6 = scmp.eq.s32.totalorder %s1551_s25, 0  ;;  %p39_p1 = scmp.ge.s32.totalorder %s2132_s26, 6 }
  0x3e   : > { %p48_p3 = scmp.eq.s32.totalorder %s46_s7, 0  ;;  %p2067_p7 = scmp.eq.s32.totalorder %s1715_s9, 0 }
  0x3f   : > { %p1732_p10 = por %p2085_p6, %p57_p5  ;;  %s169_s18 = sand.u32 1, %s1531_s20  }
  0x40   : > { %s2134_s26 = smov (%p39_p1, %s2132_s26), 0  ;;  %p1745_p9 = por %p2067_p7, %p63_p8 }
  0x41   : > { %2087 = sst [smem:[#allocation18_spill]] %s2134_s26  ;;  %s1751_s30 = ssub.s32 %s1547_s24, %s2134_s26 }
  0x42   : > { %s1741_s11 = scalar_select %p48_p3, %s1531_s20, %s50_s10  }
  0x43   : > { %s2089_s4 = scalar_select %p1745_p9, 1, 0 }
  0x44   : > { %2088 = sst [smem:[#allocation19_spill]] %s1741_s11  ;;  %s75_s5 = sor.u32 %s1751_s30, %s46_s7 }
  0x45   : > { %p2090_p11 = scmp.ne.s32.totalorder %s1515_s16, %s1511_s15  ;;  %p76_p13 = scmp.eq.s32.totalorder %s75_s5, 0 }
  0x46   : > { %s972_s1 = sshll.u32 %s169_s18, 4  ;;  %s1063_s28 = sshll.u32 %s1543_s23, 8 }
  0x47   : > { %p1759_p12 = por %p2090_p11, %p2067_p7  ;;  %s2092_s10 = sadd.s32 1, %s1519_s17 }
  0x48   : > { %s1767_s11 = scalar_select %p76_p13, %s1519_s17, %s2092_s10  }
  0x49   : > { %s2091_s27 = scalar_select %p1759_p12, 1, 0 }
  0x4a   : > { %s2093_s0 = sld [smem:[#allocation20_spill]]  ;;  %s173_s15 = scalar_lea.vmem [#allocation3], %s972_s1 }
  0x4b   : > { %s183_s7 = sshll.u32 %s173_s15, 4  ;;  %p2094_p0 = scmp.lt.s32.totalorder %s1551_s25, 36  ;;  %s1782_s7 = int_to_ptr.vmem [resolvable:$true] %s183_s7 }
  0x4c   : > { %s170_s10 = scalar_lea.sflag [#allocation4], %s169_s18 }
  0x4d   : > { %p1778_p4 = pnand %p2094_p0, %p1732_p10 }
  0x4f   : > { %p1339_p8 = pneg %p1778_p4 }
  0x50   : > { %s1772_s22 = scalar_lea.hbm %s2093_s0, %s1063_s28  ;;  %s1342_s28 = scalar_lea.hbm %s2093_s0, 1536 }
  0x51   : > { %s1337_s3 = scalar_lea.hbm %s1772_s22, 256  ;;  %p1343_p10 = scmp.lt.u32.totalorder %s1772_s22, %s2093_s0 }
  0x52   : > { %p1338_p5 = scmp.ne.s32.totalorder %s1772_s22, %s1337_s3  ;;  %p1344_p3 = scmp.lt.u32.totalorder %s1342_s28, %s1337_s3 }
  0x53   : > { %p1346_p13 = scmp.lt.u32.totalorder %s1337_s3, %s1772_s22 }
  0x54   : > { %p1340_p6 = pnand %p1339_p8, %p1338_p5  ;;  %p1345_p11 = por %p1344_p3, %p1343_p10 }
  0x56   : > { %p1341_p1 = pneg %p1340_p6  ;;  %p1347_p0 = por %p1346_p13, %p1345_p11 }
  0x58   : > { %p1348_p7 = pnand %p1347_p0, %p1341_p1 }
  0x5a   : > { %1351 = shalt.err (!%p1348_p7)
}
  0x5b   : > { %s1352_s18 = scalar_lea.vmem %s1782_s7, 256  ;;  %s1557_s1 = smov [#allocation3]  }
  0x5c   : > { %p1353_p5 = scmp.ne.s32.totalorder %s1782_s7, %s1352_s18  ;;  %s1357_s20 = sshll.u32 %s1557_s1, 4  ;;  %s1358_s20 = int_to_ptr.vmem [resolvable:$false] %s1357_s20 }
  0x5d   : > { %s1359_s8 = scalar_lea.vmem %s1358_s20, 512  ;;  %p1360_p9 = scmp.lt.s32.totalorder %s1782_s7, %s1358_s20 }
  0x5e   : > { %p1355_p6 = pnand %p1353_p5, %p1339_p8  ;;  %p1361_p10 = scmp.lt.s32.totalorder %s1359_s8, %s1352_s18 }
  0x60   : > { %p1356_p12 = pneg %p1355_p6  ;;  %p1362_p3 = por %p1361_p10, %p1360_p9 }
  0x62   : > { %p1363_p11 = pnand %p1362_p3, %p1356_p12 }
  0x64   : > { %1366 = shalt.err (!%p1363_p11)
}
  0x65   : > { %1078 = dma.hbm_to_vmem [thread:$0]  (!%p1778_p4), %s1772_s22, 256, %s1782_s7, %s170_s10  }
  0x66   : > { %s969_s3 = sadd.s32 4294967294, %s1551_s25   ;;  %p102_p7 = scmp.eq.s32.totalorder %s1751_s30, 0 }
  0x67   : > { %s104_s28 = sadd.s32 1, %s1507_s14  ;;  %p111_p9 = scmp.ne.s32.totalorder %s1507_s14, %s1503_s13 }
  0x68   : > { %s1815_s5 = scalar_select %p102_p7, %s1507_s14, %s104_s28  }
  0x69   : > { %p2096_p12 = scmp.eq.s32.totalorder %s1551_s25, 0  ;;  %p117_p1 = scmp.ne.s32.totalorder %s1503_s13, %s1499_s12 }
  0x6a   : > { %p143_p13 = scmp.eq.s32.totalorder %s1715_s9, 35  ;;  %p149_p0 = scmp.eq.s32.totalorder %s969_s3, 35 }
  0x6b   : > { %p1819_p8 = por %p111_p9, %p2096_p12  ;;  %p2098_p5 = scmp.eq.s32.totalorder %s1715_s9, 0 }
  0x6c   : > { %s216_s22 = sand.u32 1, %s1507_s14   ;;  %p1833_p4 = por %p143_p13, %p111_p9 }
  0x6d   : > { %p1828_p6 = por %p117_p1, %p2098_p5  ;;  %p1837_p10 = por %p149_p0, %p117_p1 }
  0x6e   : > { %s2100_s30 = scalar_select %p1833_p4, 1, 0 }
  0x6f   : > { %s2099_s18 = scalar_select %p1828_p6, 1, 0 }
  0x70   : > { %s2101_s7 = scalar_select %p1837_p10, 1, 0 }
  0x71   : > { %s980_s10 = sshll.u32 %s216_s22, 1  ;;  %s1064_s1 = sshll.u32 %s1547_s24, 5 }
  0x72   : > { %s1845_s3 = scalar_lea.hbm %s2060_s2, %s1064_s1  ;;  %s218_s28 = scalar_lea.vmem [#allocation8], %s980_s10 }
  0x73   : > { %s226_s0 = sshll.u32 %s218_s28, 4  ;;  %p2102_p3 = scmp.lt.s32.totalorder %s1551_s25, 36  ;;  %s227_s0 = int_to_ptr.vmem [resolvable:$true] %s226_s0 }
  0x74   : > { %s1367_s22 = scalar_lea.hbm %s1845_s3, 32  ;;  %s1372_s15 = scalar_lea.hbm %s2060_s2, 192 }
  0x75   : > { %p1851_p11 = pnand %p2102_p3, %p1819_p8  ;;  %p1368_p7 = scmp.ne.s32.totalorder %s1845_s3, %s1367_s22 }
  0x76   : > { %p1373_p8 = scmp.lt.u32.totalorder %s1845_s3, %s2060_s2  ;;  %p1374_p13 = scmp.lt.u32.totalorder %s1372_s15, %s1367_s22 }
  0x77   : > { %p1369_p9 = pneg %p1851_p11  ;;  %p1376_p5 = scmp.lt.u32.totalorder %s1367_s22, %s1845_s3 }
  0x78   : > { %p1375_p0 = por %p1374_p13, %p1373_p8 }
  0x79   : > { %p1370_p12 = pnand %p1369_p9, %p1368_p7 }
  0x7a   : > { %p1377_p3 = por %p1376_p5, %p1375_p0 }
  0x7b   : > { %p1371_p1 = pneg %p1370_p12 }
  0x7d   : > { %p1378_p10 = pnand %p1377_p3, %p1371_p1 }
  0x7f   : > { %1381 = shalt.err (!%p1378_p10)
}
  0x80   : > { %s1382_s28 = scalar_lea.vmem %s227_s0, 32  ;;  %s1558_s24 = smov [#allocation8]  }
  0x81   : > { %p1383_p4 = scmp.ne.s32.totalorder %s227_s0, %s1382_s28  ;;  %s1387_s1 = sshll.u32 %s1558_s24, 4  ;;  %s1388_s1 = int_to_ptr.vmem [resolvable:$false] %s1387_s1 }
  0x82   : > { %s1389_s10 = scalar_lea.vmem %s1388_s1, 64  ;;  %p1390_p6 = scmp.lt.s32.totalorder %s227_s0, %s1388_s1 }
  0x83   : > { %p1385_p7 = pnand %p1383_p4, %p1369_p9  ;;  %p1391_p2 = scmp.lt.s32.totalorder %s1389_s10, %s1382_s28 }
  0x85   : > { %p1386_p12 = pneg %p1385_p7  ;;  %p1392_p8 = por %p1391_p2, %p1390_p6 }
  0x87   : > { %p1393_p13 = pnand %p1392_p8, %p1386_p12 }
  0x89   : > { %1396 = shalt.err (!%p1393_p13)
}
  0x8a   : > { %1084 = dma.hbm_to_vmem [thread:$0]  (!%p1851_p11), %s1845_s3, 32, %s227_s0, %s1679_s29  }
  0x8b   : > { %p2104_p10 = scmp.ne.s32.totalorder %s2082_s6, 0 }
  0x8c   : > { %s237_s22 = sand.u32 (!%p2104_p10), 1, %s1527_s19   ;;  %p2105_p4 = scmp.ne.s32.totalorder (!%p2104_p10), %s2089_s4, 0 }
  0x8d   : > { %235 = sbr.rel (%p2104_p10) target bundleno = 490 (0x1ea), region = 32  ;;  %s1880_s15 = sshll.u32 (!%p2104_p10), %s237_s22, 4 }
  0x8e   : > { %s238_s24 = scalar_lea.sflag (!%p2104_p10), [#allocation4], %s237_s22  ;;  %s241_s20 = scalar_lea.vmem (!%p2104_p10), [#allocation3], %s1880_s15 }
  0x94   : > { %1482 = dma.done.wait (%p2105_p4), %s238_s24, 256  }
  0x95   : > { %1484 = vsyncadd (%p2105_p4), %s238_s24, 4294967040  ;;  %s246_s0 = sand.u32 1, %s1715_s9   ;;  %s248_s29 = sand.u32 1, %s1515_s16  }
  0x96   : > { %s985_s6 = sshll.u32 %s248_s29, 9  ;;  %s247_s26 = scalar_lea.sflag [#allocation7], %s246_s0 }
  0x97   : > { %s1889_s3 = scalar_lea.vmem [#allocation6], %s985_s6  ;;  %p2106_p2 = scmp.ne.s32.totalorder %s2091_s27, 0 }
  0x99   : > { %1486 = dma.done.wait (%p2106_p2), %s247_s26, 8192  }
  0x9a   : > { %1488 = vsyncadd (%p2106_p2), %s247_s26, 4294959104  ;;  %s1896_s8 = sand.u32 1, %s1503_s13   ;;  %p2107_p6 = scmp.ne.s32.totalorder %s2099_s18, 0 }
  0x9b   : > { %s986_s4 = sshll.u32 %s1896_s8, 1 }
  0x9c   : > { %s1899_s28 = scalar_lea.vmem [#allocation8], %s986_s4 }
  0x9d   : > { %1490 = dma.done.wait (%p2107_p6), %s247_s26, 32  }
  0x9e   : > { %1492 = vsyncadd (%p2107_p6), %s247_s26, 4294967264  ;;  %s987_s9 = sshll.u32 %s1896_s8, 4  ;;  %p988_p11 = scmp.ne.s32.totalorder %s1535_s21, 0 }
  0x9f   : > { %s1906_s1 = scalar_lea.vmem [#allocation9], %s987_s9  ;;  %v1559_v0 = vmov (!%p988_p11), 0.0  }
  0xa0   : > { %300 = sbr.rel (%p988_p11) target bundleno = 167 (0xa7), region = 48  ;;  %301 = vst [vmem:[#allocation2] sm:$0xff] (!%p988_p11), %v1559_v0  ;;  %302 = vst [vmem:[#allocation2 + $0x8] sm:$0xff] (!%p988_p11), %v1559_v0 }
  0xa7 PF: > { %v1207_v1 = vld [vmem:[%s1889_s3 + $0x4] ss:$8 sps:$4 sm:$0xff]   ;;  %v1211_v3 = vld [vmem:[%s1889_s3] ss:$8 sps:$4 sm:$0xff]   ;;  %v1213_v5 = vld [vmem:[%s1889_s3 + $0x14] ss:$8 sps:$4 sm:$0xff]  }
  0xa8   : > { %v1209_v2 = vld [vmem:[%s1889_s3 + $0x104] ss:$8 sps:$4 sm:$0xff]   ;;  %705 = vmatprep.subr.bf16.mxu0 %v1207_v1  ;;  %v1212_v4 = vld [vmem:[%s1889_s3 + $0x100] ss:$8 sps:$4 sm:$0xff]   ;;  %v1215_v6 = vld [vmem:[%s1889_s3 + $0x114] ss:$8 sps:$4 sm:$0xff]  }
  0xa9   : > { %746 = vmatprep.subr.bf16.mxu1 %v1209_v2  ;;  %706 = vmatpush1.bf16.msra.mxu0 %v1211_v3  ;;  %v1217_v7 = vld [vmem:[%s1889_s3 + $0x10] ss:$8 sps:$4 sm:$0xff]   ;;  %v1219_v9 = vld [vmem:[%s1889_s3 + $0x24] ss:$8 sps:$4 sm:$0xff]   ;;  %v1223_v11 = vld [vmem:[%s1889_s3 + $0x20] ss:$8 sps:$4 sm:$0xff]  }
  0xaa   : > { %747 = vmatpush1.bf16.msra.mxu1 %v1212_v4  ;;  %707 = vmatprep.subr.bf16.mxu0 %v1213_v5  ;;  %v1218_v8 = vld [vmem:[%s1889_s3 + $0x110] ss:$8 sps:$4 sm:$0xff]   ;;  %v1221_v10 = vld [vmem:[%s1889_s3 + $0x124] ss:$8 sps:$4 sm:$0xff]   ;;  %v1224_v12 = vld [vmem:[%s1889_s3 + $0x120] ss:$8 sps:$4 sm:$0xff]  }
  0xab   : > { %748 = vmatprep.subr.bf16.mxu1 %v1215_v6  ;;  %v1225_v13 = vld [vmem:[%s1889_s3 + $0x34] ss:$8 sps:$4 sm:$0xff]   ;;  %v1229_v15 = vld [vmem:[%s1889_s3 + $0x30] ss:$8 sps:$4 sm:$0xff]   ;;  %v1231_v17 = vld [vmem:[%s1889_s3 + $0x44] ss:$8 sps:$4 sm:$0xff]  }
  0xac   : > { %v1227_v14 = vld [vmem:[%s1889_s3 + $0x134] ss:$8 sps:$4 sm:$0xff]   ;;  %v1230_v16 = vld [vmem:[%s1889_s3 + $0x130] ss:$8 sps:$4 sm:$0xff]   ;;  %v1233_v18 = vld [vmem:[%s1889_s3 + $0x144] ss:$8 sps:$4 sm:$0xff]  }
  0xad   : > { %708 = vmatpush1.bf16.msra.mxu0 %v1217_v7  ;;  %v1235_v19 = vld [vmem:[%s1889_s3 + $0x40] ss:$8 sps:$4 sm:$0xff]   ;;  %v1237_v21 = vld [vmem:[%s1889_s3 + $0x54] ss:$8 sps:$4 sm:$0xff]   ;;  %v1241_v23 = vld [vmem:[%s1889_s3 + $0x50] ss:$8 sps:$4 sm:$0xff]  }
  0xae   : > { %749 = vmatpush1.bf16.msra.mxu1 %v1218_v8  ;;  %709 = vmatprep.subr.bf16.mxu0 %v1219_v9  ;;  %v1236_v20 = vld [vmem:[%s1889_s3 + $0x140] ss:$8 sps:$4 sm:$0xff]   ;;  %v1239_v22 = vld [vmem:[%s1889_s3 + $0x154] ss:$8 sps:$4 sm:$0xff]   ;;  %v1242_v24 = vld [vmem:[%s1889_s3 + $0x150] ss:$8 sps:$4 sm:$0xff]  }
  0xaf   : > { %750 = vmatprep.subr.bf16.mxu1 %v1221_v10  ;;  %v1243_v25 = vld [vmem:[%s1889_s3 + $0x64] ss:$8 sps:$4 sm:$0xff]   ;;  %v1247_v27 = vld [vmem:[%s1889_s3 + $0x60] ss:$8 sps:$4 sm:$0xff]   ;;  %v1249_v29 = vld [vmem:[%s1889_s3 + $0x74] ss:$8 sps:$4 sm:$0xff]  }
  0xb0   : > { %v1245_v26 = vld [vmem:[%s1889_s3 + $0x164] ss:$8 sps:$4 sm:$0xff]   ;;  %v1248_v28 = vld [vmem:[%s1889_s3 + $0x160] ss:$8 sps:$4 sm:$0xff]   ;;  %v1251_v30 = vld [vmem:[%s1889_s3 + $0x174] ss:$8 sps:$4 sm:$0xff]  }
  0xb1   : > { %710 = vmatpush1.bf16.msra.mxu0 %v1223_v11  ;;  %v1253_v31 = vld [vmem:[%s1889_s3 + $0x70] ss:$8 sps:$4 sm:$0xff]   ;;  %v1255_v33 = vld [vmem:[%s1889_s3 + $0x84] ss:$8 sps:$4 sm:$0xff]   ;;  %v1259_v35 = vld [vmem:[%s1889_s3 + $0x80] ss:$8 sps:$4 sm:$0xff]  }
  0xb2   : > { %751 = vmatpush1.bf16.msra.mxu1 %v1224_v12  ;;  %711 = vmatprep.subr.bf16.mxu0 %v1225_v13  ;;  %v1254_v32 = vld [vmem:[%s1889_s3 + $0x170] ss:$8 sps:$4 sm:$0xff]   ;;  %v1257_v34 = vld [vmem:[%s1889_s3 + $0x184] ss:$8 sps:$4 sm:$0xff]   ;;  %v1260_v36 = vld [vmem:[%s1889_s3 + $0x180] ss:$8 sps:$4 sm:$0xff]  }
  0xb3   : > { %752 = vmatprep.subr.bf16.mxu1 %v1227_v14  ;;  %v1261_v37 = vld [vmem:[%s1889_s3 + $0x94] ss:$8 sps:$4 sm:$0xff]   ;;  %v1265_v39 = vld [vmem:[%s1889_s3 + $0x90] ss:$8 sps:$4 sm:$0xff]   ;;  %v1267_v41 = vld [vmem:[%s1889_s3 + $0xa4] ss:$8 sps:$4 sm:$0xff]  }
  0xb4   : > { %v1263_v38 = vld [vmem:[%s1889_s3 + $0x194] ss:$8 sps:$4 sm:$0xff]   ;;  %v1266_v40 = vld [vmem:[%s1889_s3 + $0x190] ss:$8 sps:$4 sm:$0xff]   ;;  %v1269_v42 = vld [vmem:[%s1889_s3 + $0x1a4] ss:$8 sps:$4 sm:$0xff]  }
  0xb5   : > { %712 = vmatpush1.bf16.msra.mxu0 %v1229_v15  ;;  %v1271_v43 = vld [vmem:[%s1889_s3 + $0xa0] ss:$8 sps:$4 sm:$0xff]   ;;  %v1273_v45 = vld [vmem:[%s1889_s3 + $0xb4] ss:$8 sps:$4 sm:$0xff]   ;;  %v1277_v50 = vld [vmem:[%s1889_s3 + $0xb0] ss:$8 sps:$4 sm:$0xff]  }
  0xb6   : > { %753 = vmatpush1.bf16.msra.mxu1 %v1230_v16  ;;  %713 = vmatprep.subr.bf16.mxu0 %v1231_v17  ;;  %v1272_v44 = vld [vmem:[%s1889_s3 + $0x1a0] ss:$8 sps:$4 sm:$0xff]   ;;  %v1275_v46 = vld [vmem:[%s1889_s3 + $0x1b4] ss:$8 sps:$4 sm:$0xff]   ;;  %v1278_v51 = vld [vmem:[%s1889_s3 + $0x1b0] ss:$8 sps:$4 sm:$0xff]  }
  0xb7   : > { %754 = vmatprep.subr.bf16.mxu1 %v1233_v18  ;;  %v305_v47 = vld [vmem:[%s241_s20] sm:$0xff]  ;;  %v306_v49 = vld [vmem:[%s241_s20 + $0x8] sm:$0xff]  ;;  %p1057_p9 = scmp.ne.s32.totalorder %s1535_s21, 5 }
  0xb8   : > { %v990_v48 = vcombine.high %v305_v47, %v305_v47  ;;  %v992_v52 = vcombine.high %v306_v49, %v306_v49  ;;  %v1279_v53 = vld [vmem:[%s1889_s3 + $0xc4] ss:$8 sps:$4 sm:$0xff]   ;;  %v1283_v55 = vld [vmem:[%s1889_s3 + $0xc0] ss:$8 sps:$4 sm:$0xff]   ;;  %v1285_v57 = vld [vmem:[%s1889_s3 + $0xd4] ss:$8 sps:$4 sm:$0xff]   ;;  %v989_v5 = vcombine.low %v305_v47, %v305_v47  ;;  %v991_v6 = vcombine.low %v306_v49, %v306_v49 }
  0xb9   : > { %714 = vmatpush1.bf16.msra.mxu0 %v1235_v19  ;;  %v1281_v54 = vld [vmem:[%s1889_s3 + $0x1c4] ss:$8 sps:$4 sm:$0xff]   ;;  %v1284_v56 = vld [vmem:[%s1889_s3 + $0x1c0] ss:$8 sps:$4 sm:$0xff]   ;;  %v1287_v58 = vld [vmem:[%s1889_s3 + $0x1d4] ss:$8 sps:$4 sm:$0xff]  }
  0xba   : > { %755 = vmatpush1.bf16.msra.mxu1 %v1236_v20  ;;  %715 = vmatprep.subr.bf16.mxu0 %v1237_v21  ;;  %v1289_v59 = vld [vmem:[%s1889_s3 + $0xd0] ss:$8 sps:$4 sm:$0xff]   ;;  %v1291_v61 = vld [vmem:[%s1889_s3 + $0xe4] ss:$8 sps:$4 sm:$0xff]   ;;  %v1295_v63 = vld [vmem:[%s1889_s3 + $0xe0] ss:$8 sps:$4 sm:$0xff]   ;;  %v799_v21 = vlaneseq (!%p1057_p9) }
  0xbb   : > { %756 = vmatprep.subr.bf16.mxu1 %v1239_v22  ;;  %737 = vmatprep.mubr.bf16.mxu0 %v990_v48  ;;  %v1290_v60 = vld [vmem:[%s1889_s3 + $0x1d0] ss:$8 sps:$4 sm:$0xff]   ;;  %v1293_v62 = vld [vmem:[%s1889_s3 + $0x1e4] ss:$8 sps:$4 sm:$0xff]   ;;  %v1296_v0 = vld [vmem:[%s1889_s3 + $0x1e0] ss:$8 sps:$4 sm:$0xff]  }
  0xbc   : > { %778 = vmatprep.mubr.bf16.mxu1 %v992_v52  ;;  %v1297_v1 = vld [vmem:[%s1889_s3 + $0xf4] ss:$8 sps:$4 sm:$0xff]   ;;  %v1301_v3 = vld [vmem:[%s1889_s3 + $0xf0] ss:$8 sps:$4 sm:$0xff]   ;;  %v800_v22 = vshrl.u32 (!%p1057_p9), %v799_v21, 7 }
  0xbd   : > { %716 = vmatpush1.bf16.msra.mxu0 %v1241_v23  ;;  %v1299_v2 = vld [vmem:[%s1889_s3 + $0x1f4] ss:$8 sps:$4 sm:$0xff]   ;;  %v1302_v4 = vld [vmem:[%s1889_s3 + $0x1f0] ss:$8 sps:$4 sm:$0xff]   ;;  %v797_v23 = vld [vmem:[%s1899_s28] sm:$0x3] (!%p1057_p9) }
  0xbe   : > { %757 = vmatpush1.bf16.msra.mxu1 %v1242_v24  ;;  %717 = vmatprep.subr.bf16.mxu0 %v1243_v25  ;;  %v303_v8 = vld [vmem:[#allocation2] sm:$0xff]  ;;  %v304_v12 = vld [vmem:[#allocation2 + $0x8] sm:$0xff]  ;;  %v801_v24 = vsub.s32 (!%p1057_p9), 0, %v800_v22  ;;  %v805_v25 = vsub.s32 (!%p1057_p9), 1, %v800_v22 }
  0xbf   : > { %758 = vmatprep.subr.bf16.mxu1 %v1245_v26 }
  0xc1   : > { %718 = vmatpush1.bf16.msra.mxu0 %v1247_v27 }
  0xc2   : > { %759 = vmatpush1.bf16.msra.mxu1 %v1248_v28  ;;  %719 = vmatprep.subr.bf16.mxu0 %v1249_v29  ;;  %v802_v28 = vrot.slane (!%p1057_p9), %v797_v23, %v801_v24  ;;  %v806_v29 = vrot.slane (!%p1057_p9), %v797_v23, %v805_v25 }
  0xc3   : > { %760 = vmatprep.subr.bf16.mxu1 %v1251_v30 }
  0xc5   : > { %720 = vmatpush1.bf16.msra.mxu0 %v1253_v31 }
  0xc6   : > { %761 = vmatpush1.bf16.msra.mxu1 %v1254_v32  ;;  %721 = vmatprep.subr.bf16.mxu0 %v1255_v33 }
  0xc7   : > { %762 = vmatprep.subr.bf16.mxu1 %v1257_v34 }
  0xc9   : > { %722 = vmatpush1.bf16.msra.mxu0 %v1259_v35 }
  0xca   : > { %763 = vmatpush1.bf16.msra.mxu1 %v1260_v36  ;;  %723 = vmatprep.subr.bf16.mxu0 %v1261_v37 }
  0xcb   : > { %764 = vmatprep.subr.bf16.mxu1 %v1263_v38 }
  0xcd   : > { %724 = vmatpush1.bf16.msra.mxu0 %v1265_v39 }
  0xce   : > { %765 = vmatpush1.bf16.msra.mxu1 %v1266_v40  ;;  %725 = vmatprep.subr.bf16.mxu0 %v1267_v41 }
  0xcf   : > { %766 = vmatprep.subr.bf16.mxu1 %v1269_v42 }
  0xd1   : > { %726 = vmatpush1.bf16.msra.mxu0 %v1271_v43 }
  0xd2   : > { %767 = vmatpush1.bf16.msra.mxu1 %v1272_v44  ;;  %727 = vmatprep.subr.bf16.mxu0 %v1273_v45 }
  0xd3   : > { %768 = vmatprep.subr.bf16.mxu1 %v1275_v46 }
  0xd5   : > { %728 = vmatpush1.bf16.msra.mxu0 %v1277_v50 }
  0xd6   : > { %769 = vmatpush1.bf16.msra.mxu1 %v1278_v51  ;;  %729 = vmatprep.subr.bf16.mxu0 %v1279_v53 }
  0xd7   : > { %770 = vmatprep.subr.bf16.mxu1 %v1281_v54 }
  0xd9   : > { %730 = vmatpush1.bf16.msra.mxu0 %v1283_v55 }
  0xda   : > { %771 = vmatpush1.bf16.msra.mxu1 %v1284_v56  ;;  %731 = vmatprep.subr.bf16.mxu0 %v1285_v57 }
  0xdb   : > { %772 = vmatprep.subr.bf16.mxu1 %v1287_v58 }
  0xdd   : > { %732 = vmatpush1.bf16.msra.mxu0 %v1289_v59 }
  0xde   : > { %773 = vmatpush1.bf16.msra.mxu1 %v1290_v60  ;;  %733 = vmatprep.subr.bf16.mxu0 %v1291_v61 }
  0xdf   : > { %774 = vmatprep.subr.bf16.mxu1 %v1293_v62 }
  0xe1   : > { %734 = vmatpush1.bf16.msra.mxu0 %v1295_v63 }
  0xe2   : > { %775 = vmatpush1.bf16.msra.mxu1 %v1296_v0  ;;  %735 = vmatprep.subr.bf16.mxu0 %v1297_v1 }
  0xe3   : > { %776 = vmatprep.subr.bf16.mxu1 %v1299_v2 }
  0xe5   : > { %736 = vmatpush1.bf16.msra.mxu0 %v1301_v3 }
  0xe6   : > { %777 = vmatpush1.bf16.msra.mxu1 %v1302_v4 }
  0xe8   : > { %738 = vmatmul.mubr.bf16.vlgmr.msra.gmra.mrb[0].mxu0 %v989_v5 }
  0xe9   : > { %779 = vmatmul.mubr.bf16.vlgmr.msra.gmra.mrb[0].mxu1 %v991_v6 }
 0x1bb   : > { %v739_v7 = vpop.f32.mrb[0].mxu0 }
 0x1bc   : > { %v780_v9 = vpop.f32.mrb[0].mxu1  ;;  %v741_v11 = vpop.f32.mrb[1].mxu0  ;;  %794 = sbr.rel (%p1057_p9) target bundleno = 463 (0x1cf), region = 52 }
 0x1bd   : > { %v781_v10 = vadd.f32 %v780_v9, %v739_v7  ;;  %v782_v13 = vpop.f32.mrb[1].mxu1  ;;  %v743_v15 = vpop.f32.mrb[2].mxu0 }
 0x1be   : > { %v783_v14 = vadd.f32 %v782_v13, %v741_v11  ;;  %v784_v16 = vpop.f32.mrb[2].mxu1  ;;  %v744_v18 = vpop.f32.mrb[3].mxu0 }
 0x1bf   : > { %v787_v17 = vadd.f32 %v781_v10, %v303_v8  ;;  %v785_v19 = vpop.f32.mrb[3].mxu1 }
 0x1c0   : > { %v788_v20 = vadd.f32 %v783_v14, %v304_v12 }
 0x1c1   : > { %789 = vst [vmem:[#allocation2] sm:$0xff] %v787_v17 }
 0x1c2   : > { %790 = vst [vmem:[#allocation2 + $0x8] sm:$0xff] %v788_v20 }
 0x1c8   : > { %v795_v26 = vld [vmem:[#allocation2] sm:$0xff] }
 0x1c9   : > { %v796_v27 = vld [vmem:[#allocation2 + $0x8] sm:$0xff]  ;;  %v809_v30 = vadd.f32 %v802_v28, %v795_v26 }
 0x1ca   : > { %v810_v31 = vadd.f32 %v806_v29, %v796_v27 }
 0x1cb   : > { %v811_v32 = vmax.f32 %v809_v30, 0.0 }
 0x1cc   : > { %v812_v33 = vmax.f32 %v810_v31, 0.0 }
 0x1cd   : > { %813 = vst [vmem:[%s1906_s1] sm:$0xff] %v811_v32 }
 0x1ce   : > { %814 = vst [vmem:[%s1906_s1 + $0x8] sm:$0xff] %v812_v33 }
 0x1cf PF: > { %s2108_s21 = sld [smem:[#allocation15_spill]]  ;;  %s2109_s22 = sld [smem:[#allocation22_spill]] }
 0x1d0   : > { %s832_s24 = sshll.u32 %s1906_s1, 4  ;;  %s816_s20 = scalar_lea.sflag [#allocation5], %s1896_s8  ;;  %s833_s24 = int_to_ptr.vmem [resolvable:$true] %s832_s24 }
 0x1d1   : > { %s1397_s29 = scalar_lea.vmem %s833_s24, 256  ;;  %p2111_p0 = scmp.ne.s32.totalorder %s2100_s30, 0 }
 0x1d2   : > { %p1398_p1 = scmp.ne.s32.totalorder %s833_s24, %s1397_s29  ;;  %s1560_s6 = smov [#allocation9]  }
 0x1d3   : > { %s1401_s26 = sshll.u32 %s1560_s6, 4  ;;  %s1402_s26 = int_to_ptr.vmem [resolvable:$false] %s1401_s26 }
 0x1d4   : > { %p1399_p5 = pnand %p1398_p1, %p2111_p0  ;;  %s1403_s3 = scalar_lea.vmem %s1402_s26, 512 }
 0x1d5   : > { %s1065_s27 = sshll.u32 %s2108_s21, 8  ;;  %s2110_s0 = smov %s2109_s22 }
 0x1d6   : > { %s1985_s15 = scalar_lea.hbm %s2109_s22, %s1065_s27  ;;  %p1400_p3 = pneg %p1399_p5 }
 0x1d7   : > { %p1404_p7 = scmp.lt.s32.totalorder %s833_s24, %s1402_s26  ;;  %p1405_p12 = scmp.lt.s32.totalorder %s1403_s3, %s1397_s29 }
 0x1d9   : > { %p1406_p8 = por %p1405_p12, %p1404_p7 }
 0x1db   : > { %p1407_p13 = pnand %p1406_p8, %p1400_p3 }
 0x1dd   : > { %1410 = shalt.err (!%p1407_p13)
}
 0x1de   : > { %s1411_s8 = scalar_lea.hbm %s1985_s15, 256  ;;  %s1415_s9 = scalar_lea.hbm %s2110_s0, 1536 }
 0x1df   : > { %p1412_p10 = scmp.ne.s32.totalorder %s1985_s15, %s1411_s8  ;;  %p1416_p6 = scmp.lt.u32.totalorder %s1985_s15, %s2110_s0 }
 0x1e0   : > { %p1417_p11 = scmp.lt.u32.totalorder %s1415_s9, %s1411_s8  ;;  %p1419_p1 = scmp.lt.u32.totalorder %s1411_s8, %s1985_s15 }
 0x1e1   : > { %p1413_p4 = pnand %p1412_p10, %p2111_p0 }
 0x1e2   : > { %p1418_p9 = por %p1417_p11, %p1416_p6 }
 0x1e3   : > { %p1414_p2 = pneg %p1413_p4 }
 0x1e4   : > { %p1420_p5 = por %p1419_p1, %p1418_p9 }
 0x1e6   : > { %p1421_p3 = pnand %p1420_p5, %p1414_p2 }
 0x1e8   : > { %1424 = shalt.err (!%p1421_p3)
}
 0x1e9   : > { %1073 = dma.vmem_to_hbm [thread:$0]  (%p2111_p0), %s833_s24, 256, %s1985_s15, %s816_s20  }
 0x1ea PF: > { %p1090_p7 = scmp.ge.s32.totalorder %s1551_s25, 2  ;;  %s844_s27 = sand.u32 1, %s1499_s12  }
 0x1eb   : > { %p2112_p12 = scmp.ne.s32.totalorder %s2101_s7, 0  ;;  %s845_s18 = scalar_lea.sflag [#allocation5], %s844_s27 }
 0x1ed   : > { %p1086_p8 = pnand %p1090_p7, %p2112_p12 }
 0x1ef   : > { %1494 = dma.done.wait (!%p1086_p8), %s845_s18, 256  }
 0x1f0   : > { %1496 = vsyncadd (!%p1086_p8), %s845_s18, 4294967040  ;;  %s22_s25 = sadd.s32 1, %s1551_s25   ;;  %s2114_s30 = sld [smem:[#allocation14_spill]] }
 0x1f1   : > { %p2011_p13 = scmp.ge.s32.totalorder %s22_s25, 38   ;;  %s2115_s20 = sld [smem:[#allocation19_spill]] }
 0x1f2   : > { %s2116_s22 = sld [smem:[#allocation16_spill]]  ;;  %s2117_s7 = sld [smem:[#allocation17_spill]] }
 0x1f3   : > { %s2118_s24 = sld [smem:[#allocation18_spill]]  ;;  %s2119_s12 = smov %s1503_s13 }
 0x1f4   : > { %s2120_s13 = smov %s1507_s14  ;;  %s2121_s14 = smov %s1815_s5 }
 0x1f5   : > { %s2122_s15 = smov %s1515_s16  ;;  %s2123_s16 = smov %s1519_s17 }
 0x1f6   : > { %s2124_s17 = smov %s1767_s11  ;;  %s2125_s18 = smov %s1527_s19 }
 0x1f7   : > { %s2126_s19 = smov %s2114_s30  ;;  %s2127_s21 = smov %s1543_s23 }
 0x1f8   : > { %s2128_s23 = smov %s2117_s7  ;;  %21 = sbr.rel (!%p2011_p13) target bundleno = 16 (0x10), region = 109 }
 0x1ff   :  { %850 = vsyncpa [#allocation4], 1 }
 0x200   :  { %852 = vsyncpa [#allocation4 + $0x1], 1 }
 0x201   :  { %853 = vsyncpa [#allocation7], 1 }
 0x202   :  { %855 = vsyncpa [#allocation7 + $0x1], 1 }
 0x203   :  { %856 = vsyncpa [#allocation5], 1 }
 0x204   :  { %858 = vsyncpa [#allocation5 + $0x1], 1 }

</bundles_post_ra>
